<compile_context>
chip_gen: v5e
topology: v5e:2x2
jax: 0.10.0
libtpu: 0.0.40
codegen_flags: <defaults>
</compile_context>

<pallas_src>
import jax
import jax.numpy as jnp
from jax import lax
from jax.experimental import pallas as pl
from jax.experimental.pallas import tpu as pltpu


def _round_up(x, m):
    return ((x + m - 1) // m) * m


def _rl_policy_kernel(x_ref, w1_ref, b1_ref, w2_ref, b2_ref, o_ref):
    """One batch tile per grid step.

    x_ref : (TILE_B, S) f32  VMEM (streamed, double-buffered)
    w1_ref: (H, S)      f32  VMEM (resident; PyTorch Linear layout)
    b1_ref: (1, H)      f32  VMEM (resident)
    w2_ref: (1, H)      f32  VMEM (resident; PyTorch Linear layout)
    b2_ref: (1,)        f32  SMEM (scalar)
    o_ref : (1, TILE_B) f32  VMEM (lane-dense output slab)
    """
    x = x_ref[...]

    # Linear1 + ReLU: contract last dims of both operands -> (TILE_B, H),
    # MXU matmul with f32 accumulation.
    h = lax.dot_general(
        x, w1_ref[...],
        dimension_numbers=(((1,), (1,)), ((), ())),
        preferred_element_type=jnp.float32)
    h = jnp.maximum(h + b1_ref[...], 0.0)

    # Dropout(p=0.5): identity in eval mode.
    # TODO(synk): training-mode stochastic dropout not wired in.

    # Linear2 + Sigmoid, as (1,H) . (TILE_B,H)^T -> (1, TILE_B) (lane-dense).
    z = lax.dot_general(
        w2_ref[...], h,
        dimension_numbers=(((1,), (1,)), ((), ())),
        preferred_element_type=jnp.float32)
    o_ref[...] = jax.nn.sigmoid(z + b2_ref[0])


def rl_policy_net(state, w1, b1, w2, b2, *, tile_b=512):
    """state: (B, state_dim). w1: (hidden, state_dim), b1: (hidden,),
    w2: (1, hidden), b2: (1,) — PyTorch nn.Linear conventions.
    Returns (B, 1) float32."""
    B, S = state.shape
    H = w1.shape[0]

    state = state.astype(jnp.float32)

    # Tile the batch. Large tiles amortize the ~0.35us per-grid-step overhead;
    # for tiny batches just take the whole sublane-rounded batch in one step.
    tile_b = int(min(tile_b, _round_up(B, 8)))
    b_pad = _round_up(B, tile_b)
    if b_pad != B:
        state = jnp.pad(state, ((0, b_pad - B), (0, 0)))
    num_tiles = b_pad // tile_b

    b1_r = b1.reshape(1, H).astype(jnp.float32)   # (1, H) bias row (tiny, ~free)

    out = pl.pallas_call(
        _rl_policy_kernel,
        out_shape=jax.ShapeDtypeStruct((1, b_pad), jnp.float32),
        grid_spec=pltpu.PrefetchScalarGridSpec(
            num_scalar_prefetch=0,
            grid=(num_tiles,),
            in_specs=[
                # x: streamed over the batch grid.
                pl.BlockSpec((tile_b, S), lambda i: (i, 0)),
                # Weights / biases: constant index_map -> VMEM-resident.
                pl.BlockSpec((H, S), lambda i: (0, 0)),
                pl.BlockSpec((1, H), lambda i: (0, 0)),
                pl.BlockSpec((1, H), lambda i: (0, 0)),
                # b2: single scalar in SMEM (no VMEM DMA / double-buffer slot).
                pl.BlockSpec(memory_space=pltpu.MemorySpace.SMEM),
            ],
            # Lane-dense output: each grid step writes a (1, TILE_B) lane slab.
            out_specs=pl.BlockSpec((1, tile_b), lambda i: (0, i)),
        ),
        compiler_params=pltpu.CompilerParams(
            dimension_semantics=("parallel",),        # megacore on v7x
            vmem_limit_bytes=32 * 1024 * 1024,        # explicit; plenty of headroom
        ),
    )(state.astype(jnp.float32), w1.astype(jnp.float32), b1_r,
      w2.astype(jnp.float32), b2.astype(jnp.float32))

    # (1, b_pad) lane-dense slab -> (B, 1) column, dropping batch padding.
    return out.reshape(b_pad, 1)[:B]


def _reference(state, w1, b1, w2, b2):
    h = jnp.maximum(state @ w1.T + b1, 0.0)
    return jax.nn.sigmoid(h @ w2.T + b2)


if __name__ == "__main__":
    # Small shapes consistent with the module: batch=8, state_dim=16, hidden_dim=32.
    B, STATE_DIM, HIDDEN_DIM = 8, 16, 32

    key = jax.random.PRNGKey(0)
    k_x, k_w1, k_b1, k_w2, k_b2 = jax.random.split(key, 5)

    state = jax.random.normal(k_x, (B, STATE_DIM), dtype=jnp.float32)

    # Deterministic parameter init (Kaiming-uniform-ish bounds like nn.Linear).
    bound1 = 1.0 / (STATE_DIM ** 0.5)
    w1 = jax.random.uniform(k_w1, (HIDDEN_DIM, STATE_DIM), jnp.float32, -bound1, bound1)
    b1 = jax.random.uniform(k_b1, (HIDDEN_DIM,), jnp.float32, -bound1, bound1)
    bound2 = 1.0 / (HIDDEN_DIM ** 0.5)
    w2 = jax.random.uniform(k_w2, (1, HIDDEN_DIM), jnp.float32, -bound2, bound2)
    b2 = jax.random.uniform(k_b2, (1,), jnp.float32, -bound2, bound2)

    out = rl_policy_net(state, w1, b1, w2, b2)
    out = jax.block_until_ready(out)

    ref = _reference(state, w1, b1, w2, b2)
    assert out.shape == (B, 1), out.shape
    assert jnp.allclose(out, ref, atol=1e-5, rtol=1e-5), (out, ref)

    print("KERNEL_OK")
</pallas_src>

<mosaic_0001>
module attributes {stable_mosaic.version = 11 : i64} {
  func.func @_rl_policy_kernel(%arg0: i32, %arg1: memref<8x16xf32, #tpu.memory_space<vmem>>, %arg2: memref<32x16xf32, #tpu.memory_space<vmem>>, %arg3: memref<1x32xf32, #tpu.memory_space<vmem>>, %arg4: memref<1x32xf32, #tpu.memory_space<vmem>>, %arg5: memref<1xf32, #tpu.memory_space<smem>>, %arg6: memref<1x8xf32, #tpu.memory_space<vmem>>) attributes {dimension_semantics = [#tpu.dimension_semantics<parallel>], iteration_bounds = array<i64: 1>, scalar_prefetch = 0 : i64, scratch_operands = 0 : i64, tpu.core_type = #tpu.core_type<tc>, window_params = [{transform_indices = @transform_0, window_bounds = array<i64: 8, 16>}, {pipeline_mode = #tpu.pipeline_mode<synchronous>, transform_indices = @transform_1, window_bounds = array<i64: 32, 16>}, {pipeline_mode = #tpu.pipeline_mode<synchronous>, transform_indices = @transform_2, window_bounds = array<i64: 1, 32>}, {pipeline_mode = #tpu.pipeline_mode<synchronous>, transform_indices = @transform_3, window_bounds = array<i64: 1, 32>}, {transform_indices = @transform_4, window_bounds = array<i64: 1>}, {transform_indices = @transform_5, window_bounds = array<i64: 1, 8>}]} {
    %c0 = arith.constant 0 : index
    %c0_0 = arith.constant 0 : index
    %0 = vector.load %arg1[%c0, %c0_0] : memref<8x16xf32, #tpu.memory_space<vmem>>, vector<8x16xf32>
    %c0_1 = arith.constant 0 : index
    %c0_2 = arith.constant 0 : index
    %1 = vector.load %arg2[%c0_1, %c0_2] : memref<32x16xf32, #tpu.memory_space<vmem>>, vector<32x16xf32>
    %cst = arith.constant dense<0.000000e+00> : vector<8x32xf32>
    %2 = tpu.matmul %0, %1, %cst {dimension_numbers = #tpu.dot_dimension_numbers<[1], [1], [0], [0], [0, 0, 1, 0], [], []>} : vector<8x16xf32>, vector<32x16xf32>, vector<8x32xf32> -> vector<8x32xf32>
    %c0_3 = arith.constant 0 : index
    %c0_4 = arith.constant 0 : index
    %3 = vector.load %arg3[%c0_3, %c0_4] : memref<1x32xf32, #tpu.memory_space<vmem>>, vector<1x32xf32>
    %4 = vector.broadcast %3 : vector<1x32xf32> to vector<8x32xf32>
    %5 = arith.addf %2, %4 : vector<8x32xf32>
    %cst_5 = arith.constant 0.000000e+00 : f32
    %6 = vector.broadcast %cst_5 : f32 to vector<8x32xf32>
    %7 = arith.maximumf %5, %6 : vector<8x32xf32>
    %c0_6 = arith.constant 0 : index
    %c0_7 = arith.constant 0 : index
    %8 = vector.load %arg4[%c0_6, %c0_7] : memref<1x32xf32, #tpu.memory_space<vmem>>, vector<1x32xf32>
    %cst_8 = arith.constant dense<0.000000e+00> : vector<1x8xf32>
    %9 = tpu.matmul %8, %7, %cst_8 {dimension_numbers = #tpu.dot_dimension_numbers<[1], [1], [0], [0], [0, 0, 1, 0], [], []>} : vector<1x32xf32>, vector<8x32xf32>, vector<1x8xf32> -> vector<1x8xf32>
    %c0_9 = arith.constant 0 : index
    %10 = memref.load %arg5[%c0_9] : memref<1xf32, #tpu.memory_space<smem>>
    %11 = vector.broadcast %10 : f32 to vector<1x8xf32>
    %12 = arith.addf %9, %11 : vector<1x8xf32>
    %13 = arith.negf %12 : vector<1x8xf32>
    %14 = math.exp %13 : vector<1x8xf32>
    %cst_10 = arith.constant 1.000000e+00 : f32
    %15 = vector.broadcast %cst_10 : f32 to vector<1x8xf32>
    %16 = arith.addf %15, %14 : vector<1x8xf32>
    %17 = arith.divf %15, %16 : vector<1x8xf32>
    %c0_11 = arith.constant 0 : index
    %c0_12 = arith.constant 0 : index
    %18 = vector.load %arg6[%c0_11, %c0_12] : memref<1x8xf32, #tpu.memory_space<vmem>>, vector<1x8xf32>
    tpu.vector_store %arg6[%c0_11, %c0_12], %17 {strides = array<i32>} : memref<1x8xf32, #tpu.memory_space<vmem>>, vector<1x8xf32>,
    return
  }
  func.func @transform_0(%arg0: i32) -> (i32, i32) {
    %c0_i32 = arith.constant 0 : i32
    %c0_i32_0 = arith.constant 0 : i32
    return %arg0, %c0_i32 : i32, i32
  }
  func.func @transform_1(%arg0: i32) -> (i32, i32) {
    %c0_i32 = arith.constant 0 : i32
    %c0_i32_0 = arith.constant 0 : i32
    %c0_i32_1 = arith.constant 0 : i32
    return %c0_i32, %c0_i32_0 : i32, i32
  }
  func.func @transform_2(%arg0: i32) -> (i32, i32) {
    %c0_i32 = arith.constant 0 : i32
    %c0_i32_0 = arith.constant 0 : i32
    %c0_i32_1 = arith.constant 0 : i32
    return %c0_i32, %c0_i32_0 : i32, i32
  }
  func.func @transform_3(%arg0: i32) -> (i32, i32) {
    %c0_i32 = arith.constant 0 : i32
    %c0_i32_0 = arith.constant 0 : i32
    %c0_i32_1 = arith.constant 0 : i32
    return %c0_i32, %c0_i32_0 : i32, i32
  }
  func.func @transform_4(%arg0: i32) -> i32 {
    %c0_i32 = arith.constant 0 : i32
    %c0_i32_0 = arith.constant 0 : i32
    return %c0_i32 : i32
  }
  func.func @transform_5(%arg0: i32) -> (i32, i32) {
    %c0_i32 = arith.constant 0 : i32
    %c0_i32_0 = arith.constant 0 : i32
    return %c0_i32, %arg0 : i32, i32
  }
}

</mosaic_0001>

<bundles_post_ra>
// kernel: tpu_custom_call.1
= control target key start
LH: loop header
LB: loop body
LE: loop exit
PB: predicated region body
PF: predicated region fallthrough
CT: control target
= control target key end

     0   :  { %vm31_vm0 = vcmask 130048   ;;  %s233_s0 = inlined_call_operand.vmem [shape: f32[8,16], index: 0, kind: input, shape index: {}]   ;;  %s234_s1 = inlined_call_operand.vmem [shape: f32[32,16], index: 1, kind: input, shape index: {}]   ;;  %s235_s2 = inlined_call_operand.vmem [shape: f32[1,32], index: 2, kind: input, shape index: {}]   ;;  %s236_s3 = inlined_call_operand.vmem [shape: f32[1,32], index: 3, kind: input, shape index: {}]   ;;  %s237_s4 = inlined_call_operand.<no memory space> [shape: f32[1], index: 4, kind: input, shape index: {}]   ;;  %s238_s5 = inlined_call_operand.hbm [shape: f32[1,8], index: 5, kind: output, shape index: {}]  }
   0x1   :  { %v26_v0 = vld [vmem:[%s234_s1 + $0x18] sm:$0xff]  ;;  %v25_v1 = vld [vmem:[%s234_s1 + $0x10] sm:$0xff] }
   0x2   :  { %135 = vmatpush.xpose.msk.msra.mxu0 %vm31_vm0, %v26_v0 }
   0x3   :  { %11 = vsyncpa [#allocation4], 0  ;;  %v24_v2 = vld [vmem:[%s234_s1 + $0x8] sm:$0xff]  ;;  %v23_v3 = vld [vmem:[%s234_s1] sm:$0xff]  ;;  %vm71_vm1 = vcmask 261120   ;;  %v70_v10 = vstv %s237_s4  ;;  %s126_s4 = sshll.u32 %s238_s5, 4  ;;  %s127_s4 = int_to_ptr.hbm [resolvable:$true] %s126_s4 }
   0x4   :  { %v22_v4 = vld [vmem:[%s233_s0] sm:$0xff]  ;;  %s175_s0 = smov [#allocation3]   ;;  %vm117_vm5 = vcmask 57344  }
   0x5   :  { %v144_v5 = vld [vmem:[%s235_s2] ss:$0 sm:$0xff]  ;;  %s124_s2 = sshll.u32 %s175_s0, 4  ;;  %s125_s2 = int_to_ptr.vmem [resolvable:$true] %s124_s2 }
   0x6   :  { %136 = vmatpush.xpose.msk.msra.mxu0 %vm31_vm0, %v25_v1  ;;  %v68_v9 = vld [vmem:[%s236_s3] sm:$0x1] }
   0xa   :  { %137 = vmatpush.xpose.msk.msra.mxu0 %vm31_vm0, %v24_v2 }
   0xe   :  { %138 = vmatpush.xpose.msk.msra.mxu0 %vm31_vm0, %v23_v3 }
  0x11   :  { %139 = vmatmul.msk.f32.vlgmr.msra.gmra.mxu0 %vm31_vm0, %v22_v4 }
  0x8e   :  { %v64_v6 = vpop.f32.mrf.mxu0 }
  0x8f   :  { %v65_v7 = vadd.f32 %v144_v5, %v64_v6 }
  0x91   :  { %v67_v8 = vmax.f32 %v65_v7, 0.0 }
  0x93   :  { %140 = vmatpush.xpose.msk.msra.mxu1 %vm71_vm1, %v67_v8 }
  0x96   :  { %141 = vmatmul.msk.f32.vlgmr.msra.gmra.mxu1 %vm71_vm1, %v68_v9 }
 0x113   :  { %v95_v11 = vpop.f32.mrf.mxu1 }
 0x114   :  { %v96_v12 = vadd.f32 %v95_v11, %v70_v10 }
 0x116   :  { %v142_v13 = vmul.f32 -1.442695, %v96_v12 }
 0x118   :  { %145 = vpow2.f32 %v142_v13 }
 0x11e   :  { %v146_v14 = vpop.eup %145 }
 0x11f   :  { %v101_v15 = vadd.f32 1.0, %v146_v14 }
 0x121   :  { %147 = vrcp.f32 %v101_v15  ;;  %v113_v19 = vand.u32 2147483648, %v101_v15  ;;  %v111_v21 = vand.u32 2147483647, %v101_v15  ;;  %vm107_vm3 = vweird.f32 %v101_v15 }
 0x123   :  { %v114_v23 = vor.u32 1.1754944e-38, %v113_v19  ;;  %vm112_vm6 = vcmp.eq.f32.partialorder %v111_v21, 8.507059e+37 }
 0x127   :  { %v148_v16 = vpop.eup %147 }
 0x128   :  { %v103_v17 = vmul.f32 %v148_v16, %v101_v15  ;;  %vm108_vm2 = vweird.f32 %v148_v16 }
 0x129   :  { %vm109_vm4 = vmor %vm107_vm3, %vm108_vm2 }
 0x12a   :  { %v104_v18 = vsub.f32 1.0, %v103_v17 }
 0x12c   :  { %v105_v20 = vmul.f32 %v148_v16, %v104_v18 }
 0x12e   :  { %v106_v22 = vadd.f32 %v148_v16, %v105_v20 }
 0x130   :  { %v110_v24 = vsel %vm109_vm4, %v148_v16, %v106_v22 }
 0x131   :  { %v115_v25 = vsel %vm112_vm6, %v114_v23, %v110_v24 }
 0x132   :  { %118 = vst.msk [vmem:[#allocation3] sm:$0x1] %vm117_vm5, %v115_v25 }
 0x133   :  { %129 = dma.vmem_to_hbm [thread:$0]  %s125_s2, 16, %s127_s4, [#allocation4]  }
 0x134   :  { %173 = dma.done.wait [#allocation4], 16  }
 0x135   :  { %174 = vsyncadd [#allocation4], 4294967280 }
 0x136   :  { %134 = vsyncpa [#allocation4], 1 }

</bundles_post_ra>
